<compile_context>
chip_gen: v6e
topology: v6e:2x2x1
jax: 0.10.0
libtpu: 0.0.40
codegen_flags: <defaults>
</compile_context>

<pallas_src>
import jax
import jax.numpy as jnp
from jax.experimental import pallas as pl
from jax.experimental.pallas import tpu as pltpu

_LANES = 128
_SUBLANES = 8
_MAX_TILE_ROWS = 2048          # 2 MiB f32 block; ~8 MiB VMEM with dbl-buffered in+out
_MIN_PALLAS_COLS = 256 * 1024  # below this, plain fusible XLA wins over a kernel launch
_TARGET_TILES = 8              # enough grid steps to feed both v7x TensorCores


def _round_up(x, mult):
    return ((x + mult - 1) // mult) * mult


def _rotate_kernel(r_ref, v_ref, o_ref):
    # r_ref: (4,) f32 in SMEM = flattened (n @ m) = [[r00, r01], [r10, r11]].
    # v_ref / o_ref: (2, tile_rows, 128) blocks in VMEM.
    r00 = r_ref[0]
    r01 = r_ref[1]
    r10 = r_ref[2]
    r11 = r_ref[3]
    v0 = v_ref[0]
    v1 = v_ref[1]
    o_ref[0] = (r00 * v0 + r01 * v1).astype(o_ref.dtype)
    o_ref[1] = (r10 * v0 + r11 * v1).astype(o_ref.dtype)


def rotate_forward(m, n, v, *, max_tile_rows=_MAX_TILE_ROWS,
                   min_pallas_cols=_MIN_PALLAS_COLS):
    """m: [2,2] param, n: [2,2] buffer, v: [2, N] -> [2, N] = n @ (m @ v)."""
    assert m.shape == (2, 2) and n.shape == (2, 2)
    assert v.ndim == 2 and v.shape[0] == 2
    n_cols = v.shape[1]
    out_dtype = v.dtype

    # Fold the two 2x2 rotations once (tiny XLA dot in the wrapper).
    # Note: reassociates FP ops vs the reference n @ (m @ v) — last-ulp only.
    r = jnp.matmul(n.astype(jnp.float32), m.astype(jnp.float32))

    # Small-N fast path: fused XLA elementwise, no pallas_call / reshape overhead.
    if n_cols < min_pallas_cols:
        return jnp.matmul(r, v.astype(jnp.float32)).astype(out_dtype)

    # ---- Pallas streaming path: [2, rows, 128] sublane/lane-dense layout. ----
    rows_needed = pl.cdiv(n_cols, _LANES)
    rows_total = _round_up(rows_needed, _SUBLANES)   # pad cols only to multiple of 1024
    n_padded = rows_total * _LANES

    # Aim for ~_TARGET_TILES grid steps (keeps both v7x TCs busy), capped at
    # max_tile_rows (2 MiB blocks) and kept a multiple of 8 sublanes.
    tile_rows = min(
        max_tile_rows,
        max(_SUBLANES, _round_up(pl.cdiv(rows_total, _TARGET_TILES), _SUBLANES)),
    )
    num_tiles = pl.cdiv(rows_total, tile_rows)       # final block may be partial

    v_in = v
    if n_padded != n_cols:
        # Only when N % 1024 != 0 (needed for the (rows,128) view).
        v_in = jnp.pad(v_in, ((0, 0), (0, n_padded - n_cols)))
    v3 = v_in.reshape(2, rows_total, _LANES)

    itemsize = jnp.dtype(out_dtype).itemsize
    cost = pl.CostEstimate(
        flops=6 * n_padded,
        transcendentals=0,
        bytes_accessed=4 * n_padded * itemsize + 16,  # read v + write out + r
    )

    out3 = pl.pallas_call(
        _rotate_kernel,
        out_shape=jax.ShapeDtypeStruct((2, rows_total, _LANES), out_dtype),
        grid=(num_tiles,),
        in_specs=[
            # Folded 2x2 as 4 scalars in SMEM (whole array, untiled).
            pl.BlockSpec(memory_space=pltpu.MemorySpace.SMEM),
            # v tile: (2, tile_rows, 128) — last two dims (8,128)-aligned.
            pl.BlockSpec((2, tile_rows, _LANES), lambda i: (0, i, 0)),
        ],
        out_specs=pl.BlockSpec((2, tile_rows, _LANES), lambda i: (0, i, 0)),
        compiler_params=pltpu.CompilerParams(
            dimension_semantics=("parallel",),
        ),
        cost_estimate=cost,
    )(r.reshape(4), v3)

    out = out3.reshape(2, n_padded)
    if n_padded != n_cols:
        out = out[:, :n_cols]
    return out


if __name__ == "__main__":
    key = jax.random.PRNGKey(0)
    k_m, k_n, k_v = jax.random.split(key, 3)

    # Deterministic U[0,1) init of the 2x2 matrices (torch.rand analogue).
    m = jax.random.uniform(k_m, (2, 2), dtype=jnp.float32)
    n = jax.random.uniform(k_n, (2, 2), dtype=jnp.float32)

    def ref(v):
        return n @ (m @ v)

    # 1) Pallas path, N a multiple of 1024 (no pad / no slice), 2 grid steps.
    N1 = 2048
    v1 = jax.random.uniform(k_v, (2, N1), dtype=jnp.float32)
    out1 = jax.block_until_ready(rotate_forward(m, n, v1, min_pallas_cols=0))
    assert out1.shape == (2, N1)
    assert jnp.allclose(out1, ref(v1), atol=1e-5, rtol=1e-5), "mismatch (aligned)"

    # 2) Pallas path with a partial final block (rows=72, tile_rows=16, 5 steps).
    N2 = 9216
    v2 = jax.random.uniform(jax.random.PRNGKey(1), (2, N2), dtype=jnp.float32)
    out2 = jax.block_until_ready(rotate_forward(m, n, v2, min_pallas_cols=0))
    assert out2.shape == (2, N2)
    assert jnp.allclose(out2, ref(v2), atol=1e-5, rtol=1e-5), "mismatch (partial block)"

    # 3) Pallas path, ragged N (pad to 1024 columns + slice back).
    N3 = 200
    v3 = jax.random.uniform(jax.random.PRNGKey(2), (2, N3), dtype=jnp.float32)
    out3 = jax.block_until_ready(rotate_forward(m, n, v3, min_pallas_cols=0))
    assert out3.shape == (2, N3)
    assert jnp.allclose(out3, ref(v3), atol=1e-5, rtol=1e-5), "mismatch (ragged)"

    # 4) Default small-N fast path (bypasses Pallas for tiny inputs).
    out4 = jax.block_until_ready(rotate_forward(m, n, v1))
    assert jnp.allclose(out4, ref(v1), atol=1e-5, rtol=1e-5), "mismatch (fast path)"

    print("KERNEL_OK")
</pallas_src>

<mosaic_0001>
module attributes {stable_mosaic.version = 11 : i64} {
  func.func @_rotate_kernel(%arg0: i32, %arg1: memref<4xf32, #tpu.memory_space<smem>>, %arg2: memref<2x8x128xf32, #tpu.memory_space<vmem>>, %arg3: memref<2x8x128xf32, #tpu.memory_space<vmem>>) attributes {dimension_semantics = [#tpu.dimension_semantics<parallel>], iteration_bounds = array<i64: 2>, scalar_prefetch = 0 : i64, scratch_operands = 0 : i64, tpu.core_type = #tpu.core_type<tc>, window_params = [{transform_indices = @transform_0, window_bounds = array<i64: 4>}, {transform_indices = @transform_1, window_bounds = array<i64: 2, 8, 128>}, {transform_indices = @transform_2, window_bounds = array<i64: 2, 8, 128>}]} {
    %c0 = arith.constant 0 : index
    %0 = memref.load %arg1[%c0] : memref<4xf32, #tpu.memory_space<smem>>
    %c1 = arith.constant 1 : index
    %1 = memref.load %arg1[%c1] : memref<4xf32, #tpu.memory_space<smem>>
    %c2 = arith.constant 2 : index
    %2 = memref.load %arg1[%c2] : memref<4xf32, #tpu.memory_space<smem>>
    %c3 = arith.constant 3 : index
    %3 = memref.load %arg1[%c3] : memref<4xf32, #tpu.memory_space<smem>>
    %c0_0 = arith.constant 0 : index
    %c0_1 = arith.constant 0 : index
    %c0_2 = arith.constant 0 : index
    %4 = vector.load %arg2[%c0_0, %c0_1, %c0_2] : memref<2x8x128xf32, #tpu.memory_space<vmem>>, vector<1x8x128xf32>
    %5 = vector.shape_cast %4 : vector<1x8x128xf32> to vector<8x128xf32>
    %c1_3 = arith.constant 1 : index
    %c0_4 = arith.constant 0 : index
    %c0_5 = arith.constant 0 : index
    %6 = vector.load %arg2[%c1_3, %c0_4, %c0_5] : memref<2x8x128xf32, #tpu.memory_space<vmem>>, vector<1x8x128xf32>
    %7 = vector.shape_cast %6 : vector<1x8x128xf32> to vector<8x128xf32>
    %8 = vector.broadcast %0 : f32 to vector<8x128xf32>
    %9 = arith.mulf %8, %5 : vector<8x128xf32>
    %10 = vector.broadcast %1 : f32 to vector<8x128xf32>
    %11 = arith.mulf %10, %7 : vector<8x128xf32>
    %12 = arith.addf %9, %11 : vector<8x128xf32>
    %c0_6 = arith.constant 0 : index
    %c0_7 = arith.constant 0 : index
    %c0_8 = arith.constant 0 : index
    %13 = vector.load %arg3[%c0_6, %c0_7, %c0_8] : memref<2x8x128xf32, #tpu.memory_space<vmem>>, vector<1x8x128xf32>
    %14 = vector.shape_cast %13 : vector<1x8x128xf32> to vector<8x128xf32>
    %15 = vector.shape_cast %12 : vector<8x128xf32> to vector<1x8x128xf32>
    tpu.vector_store %arg3[%c0_6, %c0_7, %c0_8], %15 {strides = array<i32>} : memref<2x8x128xf32, #tpu.memory_space<vmem>>, vector<1x8x128xf32>,
    %16 = vector.broadcast %2 : f32 to vector<8x128xf32>
    %17 = arith.mulf %16, %5 : vector<8x128xf32>
    %18 = vector.broadcast %3 : f32 to vector<8x128xf32>
    %19 = arith.mulf %18, %7 : vector<8x128xf32>
    %20 = arith.addf %17, %19 : vector<8x128xf32>
    %c1_9 = arith.constant 1 : index
    %c0_10 = arith.constant 0 : index
    %c0_11 = arith.constant 0 : index
    %21 = vector.load %arg3[%c1_9, %c0_10, %c0_11] : memref<2x8x128xf32, #tpu.memory_space<vmem>>, vector<1x8x128xf32>
    %22 = vector.shape_cast %21 : vector<1x8x128xf32> to vector<8x128xf32>
    %23 = vector.shape_cast %20 : vector<8x128xf32> to vector<1x8x128xf32>
    tpu.vector_store %arg3[%c1_9, %c0_10, %c0_11], %23 {strides = array<i32>} : memref<2x8x128xf32, #tpu.memory_space<vmem>>, vector<1x8x128xf32>,
    return
  }
  func.func @transform_0(%arg0: i32) -> i32 {
    %c0_i32 = arith.constant 0 : i32
    %c0_i32_0 = arith.constant 0 : i32
    return %c0_i32 : i32
  }
  func.func @transform_1(%arg0: i32) -> (i32, i32, i32) {
    %c0_i32 = arith.constant 0 : i32
    %c0_i32_0 = arith.constant 0 : i32
    %c0_i32_1 = arith.constant 0 : i32
    return %c0_i32, %arg0, %c0_i32_0 : i32, i32, i32
  }
  func.func @transform_2(%arg0: i32) -> (i32, i32, i32) {
    %c0_i32 = arith.constant 0 : i32
    %c0_i32_0 = arith.constant 0 : i32
    %c0_i32_1 = arith.constant 0 : i32
    return %c0_i32, %arg0, %c0_i32_0 : i32, i32, i32
  }
}

</mosaic_0001>

<bundles_post_ra>
// kernel: tpu_custom_call.1
= control target key start
LH: loop header
LB: loop body
LE: loop exit
PB: predicated region body
PF: predicated region fallthrough
CT: control target
= control target key end

     0   :  { %7 = vsyncpa [#allocation5], 0  ;;  %s679_s0 = inlined_call_operand.hbm [shape: f32[4], index: 0, kind: input, shape index: {}]   ;;  %s680_s1 = inlined_call_operand.hbm [shape: f32[2,16,128], index: 1, kind: input, shape index: {}]   ;;  %s681_s2 = inlined_call_operand.hbm [shape: f32[2,16,128], index: 2, kind: output, shape index: {}]  }
   0x1   :  { %8 = vsyncpa [#allocation3], 0 }
   0x2   :  { %10 = vsyncpa [#allocation3 + $0x1], 0 }
   0x3   :  { %11 = vsyncpa [#allocation4], 0 }
   0x4   :  { %13 = vsyncpa [#allocation4 + $0x1], 0  ;;  %s506_s9 = smov 0   ;;  %s508_s10 = smov 0  }
   0x5   :  { %s510_s11 = smov 0   ;;  %s512_s12 = smov 0  }
   0x6 LB: > { %s527_s13 = sadd.s32 4294967295, %s480_s12   ;;  %s291_s14 = sadd.s32 4294967294, %s480_s12   ;;  %s480_s12 = sphi %s512_s12, %s703_s12   ;;  %s476_s11 = sphi %s510_s11, %s702_s11   ;;  %s472_s10 = sphi %s508_s10, %s701_s10   ;;  %s468_s9 = sphi %s506_s9, %s700_s9  }
   0x7   : > { %s531_s15 = sadd.s32 1, %s480_s12   ;;  %s47_s16 = sadd.s32 1, %s476_s11 }
   0x8   : > { %s44_s17 = ssub.s32 %s480_s12, %s531_s15  ;;  %p54_p0 = scmp.ne.s32.totalorder %s476_s11, %s472_s10 }
   0x9   : > { %p45_p1 = scmp.eq.s32.totalorder %s44_s17, 0  ;;  %p55_p2 = scmp.eq.s32.totalorder %s480_s12, 0 }
   0xa   : > { %p60_p3 = scmp.ne.s32.totalorder %s472_s10, %s468_s9  ;;  %p682_p4 = scmp.eq.s32.totalorder %s527_s13, 0 }
   0xb   : > { %s543_s18 = scalar_select %p45_p1, %s476_s11, %s47_s16  }
   0xc   : > { %p545_p5 = por %p55_p2, %p54_p0  ;;  %p551_p6 = por %p682_p4, %p60_p3 }
   0xd   : > { %p84_p7 = scmp.eq.s32.totalorder %s527_s13, 1  ;;  %p90_p8 = scmp.eq.s32.totalorder %s291_s14, 1 }
   0xe   : > { %s687_s20 = scalar_select %p551_p6, 1, 0 }
   0xf   : > { %p292_p9 = scmp.ge.s32.totalorder %s480_s12, 1  ;;  %p97_p10 = scmp.lt.s32.totalorder %s480_s12, 3 }
  0x10   : > { %p558_p11 = por %p84_p7, %p54_p0  ;;  %p562_p12 = por %p90_p8, %p60_p3 }
  0x11   : > { %p566_p13 = pnand %p292_p9, %p97_p10  ;;  %p331_p4 = scmp.lt.s32.totalorder %s480_s12, 2 }
  0x12   : > { %s688_s21 = scalar_select %p558_p11, 1, 0 }
  0x13   : > { %s689_s22 = scalar_select %p562_p12, 1, 0 }
  0x14   : > { %s690_s23 = scalar_select %p566_p13, 1, 0 }
  0x15   : > { %p318_p2 = pneg %p566_p13  ;;  %s119_s24 = sand.u32 1, %s476_s11  }
  0x16   : > { %s296_s25 = sshll.u32 %s480_s12, 7  ;;  %p691_p6 = scmp.eq.s32.totalorder %s527_s13, 0 }
  0x17   : > { %p580_p7 = pnand %p331_p4, %p545_p5  ;;  %s295_s27 = sshll.u32 %s119_s24, 4 }
  0x18   : > { %p319_p0 = pnand %p318_p2, %p691_p6  ;;  %s482_s28 = smov [#allocation2]  }
  0x19   : > { %s590_s5 = scalar_lea.hbm %s680_s1, %s296_s25  ;;  %s123_s6 = scalar_lea.vmem [#allocation6], %s295_s27 }
  0x1a   : > { %321 = dma.hbm_to_smem (!%p319_p0), %s679_s0, 16, %s482_s28, [#allocation5]  }
  0x1b   : > { %s129_s7 = sshll.u32 %s123_s6, 4  ;;  %s594_s8 = scalar_lea.sflag [#allocation3], %s119_s24  ;;  %s592_s7 = int_to_ptr.vmem [resolvable:$true] %s129_s7 }
  0x1c   : > { %s384_s14 = scalar_lea.hbm %s590_s5, 256  ;;  %p386_p4 = pneg %p580_p7 }
  0x1d   : > { %p385_p3 = scmp.ne.s32.totalorder %s590_s5, %s384_s14  ;;  %s389_s19 = scalar_lea.hbm %s680_s1, 512 }
  0x1e   : > { %p390_p8 = scmp.lt.s32.totalorder %s590_s5, %s680_s1  ;;  %p391_p9 = scmp.lt.s32.totalorder %s389_s19, %s384_s14 }
  0x1f   : > { %p387_p5 = pnand %p386_p4, %p385_p3 }
  0x20   : > { %p392_p10 = por %p391_p9, %p390_p8 }
  0x21   : > { %p388_p6 = pneg %p387_p5 }
  0x23   : > { %p393_p2 = pnand %p392_p10, %p388_p6 }
  0x25   : > { %396 = shalt.err (!%p393_p2)
}
  0x26   : > { %s397_s24 = scalar_lea.vmem %s592_s7, 256  ;;  %s483_s27 = smov [#allocation6]  }
  0x27   : > { %p398_p0 = scmp.ne.s32.totalorder %s592_s7, %s397_s24  ;;  %s402_s29 = sshll.u32 %s483_s27, 4  ;;  %s403_s29 = int_to_ptr.vmem [resolvable:$false] %s402_s29 }
  0x28   : > { %s404_s30 = scalar_lea.vmem %s403_s29, 512  ;;  %p405_p5 = scmp.lt.s32.totalorder %s592_s7, %s403_s29 }
  0x29   : > { %p400_p1 = pnand %p398_p0, %p386_p4  ;;  %p406_p12 = scmp.lt.s32.totalorder %s404_s30, %s397_s24 }
  0x2b   : > { %p401_p3 = pneg %p400_p1  ;;  %p407_p11 = por %p406_p12, %p405_p5 }
  0x2d   : > { %p408_p13 = pnand %p407_p11, %p401_p3 }
  0x2f   : > { %411 = shalt.err (!%p408_p13)
}
  0x30   : > { %s484_s3 = smov 256   ;;  %s485_s4 = smov 128  }
  0x31   : > { %s486_s6 = smov 8   ;;  %p693_p1 = scmp.ne.s32.totalorder %s690_s23, 0 }
  0x32   : > { %325 = dma.hbm_to_vmem [thread:$0]  (!%p580_p7), %s590_s5, 256, %s592_s7, %s594_s8, %s484_s3, %s485_s4, %s486_s6  }
  0x33   : > { %141 = sbr.rel (%p693_p1) target bundleno = 92 (0x5c), region = 28  ;;  %p694_p4 = scmp.eq.s32.totalorder (!%p693_p1), %s527_s13, 0 }
  0x38   : > { %455 = dma.done.wait (%p694_p4), [#allocation5], 16   ;;  %p695_p6 = pmov %p694_p4 }
  0x39   : > { %s622_s14 = sand.u32 1, %s472_s10   ;;  %p696_p11 = scmp.ne.s32.totalorder %s687_s20, 0 }
  0x3a   : > { %457 = vsyncadd (%p695_p6), [#allocation5], 4294967280  ;;  %s299_s16 = sshll.u32 %s622_s14, 4  ;;  %s148_s17 = scalar_lea.sflag [#allocation3], %s622_s14 }
  0x3b   : > { %s151_s19 = scalar_lea.vmem [#allocation6], %s299_s16 }
  0x3c   : > { %459 = dma.done.wait (%p696_p11), %s148_s17, 256  }
  0x3d   : > { %461 = vsyncadd (%p696_p11), %s148_s17, 4294967040 }
  0x3e   : > { %156 = sfence }
  0x3f   : > { %s173_s23 = sld [smem:[#allocation2]]  ;;  %v177_v0 = vld [vmem:[%s151_s19] sm:$0xff]  ;;  %v304_v1 = vld [vmem:[%s151_s19 + $0x8] sm:$0xff]  ;;  %s172_s8 = scalar_lea.vmem [#allocation7], %s299_s16 }
  0x40   : > { %s301_s26 = sld [smem:[#allocation2 + $0x1]]  ;;  %s206_s25 = sshll.u32 %s172_s8, 4  ;;  %s631_s25 = int_to_ptr.vmem [resolvable:$true] %s206_s25 }
  0x41   : > { %s302_s5 = sld [smem:[#allocation2 + $0x2]]  ;;  %s307_s28 = sshll.u32 %s527_s13, 7 }
  0x42   : > { %s303_s7 = sld [smem:[#allocation2 + $0x3]]  ;;  %s636_s27 = scalar_lea.hbm %s681_s2, %s307_s28 }
  0x43   : > { %s194_s29 = scalar_lea.sflag [#allocation4], %s622_s14  ;;  %s412_s30 = scalar_lea.vmem %s631_s25, 256 }
  0x44   : > { %p413_p12 = scmp.ne.s32.totalorder %s631_s25, %s412_s30  ;;  %p697_p13 = scmp.ne.s32.totalorder %s688_s21, 0 }
  0x45   : > { %v180_v2 = vstv %s173_s23  ;;  %s487_s13 = smov [#allocation7]  }
  0x46   : > { %v181_v3 = vmul.f32 %v180_v2, %v177_v0  ;;  %v182_v4 = vstv %s301_s26  ;;  %p414_p7 = pnand %p413_p12, %p697_p13  ;;  %s416_s3 = sshll.u32 %s487_s13, 4  ;;  %s417_s3 = int_to_ptr.vmem [resolvable:$false] %s416_s3 }
  0x47   : > { %v183_v5 = vmul.f32 %v304_v1, %v182_v4  ;;  %v186_v6 = vstv %s302_s5  ;;  %s418_s4 = scalar_lea.vmem %s417_s3, 512  ;;  %p419_p9 = scmp.lt.s32.totalorder %s631_s25, %s417_s3 }
  0x48   : > { %v187_v7 = vmul.f32 %v186_v6, %v177_v0  ;;  %v188_v8 = vstv %s303_s7  ;;  %p415_p8 = pneg %p414_p7  ;;  %p420_p10 = scmp.lt.s32.totalorder %s418_s4, %s412_s30 }
  0x49   : > { %v184_v9 = vadd.f32 %v183_v5, %v181_v3  ;;  %v189_v10 = vmul.f32 %v304_v1, %v188_v8 }
  0x4a   : > { %p421_p2 = por %p420_p10, %p419_p9 }
  0x4b   : > { %185 = vst [vmem:[%s172_s8] sm:$0xff] %v184_v9  ;;  %v190_v11 = vadd.f32 %v189_v10, %v187_v7 }
  0x4c   : > { %p422_p0 = pnand %p421_p2, %p415_p8 }
  0x4d   : > { %305 = vst [vmem:[%s172_s8 + $0x8] sm:$0xff] %v190_v11 }
  0x4e   : > { %425 = shalt.err (!%p422_p0)
}
  0x4f   : > { %s426_s6 = scalar_lea.hbm %s636_s27, 256  ;;  %s430_s19 = scalar_lea.hbm %s681_s2, 512 }
  0x50   : > { %p427_p3 = scmp.ne.s32.totalorder %s636_s27, %s426_s6  ;;  %p431_p4 = scmp.lt.s32.totalorder %s636_s27, %s681_s2 }
  0x51   : > { %p432_p6 = scmp.lt.s32.totalorder %s430_s19, %s426_s6 }
  0x52   : > { %p428_p5 = pnand %p427_p3, %p697_p13 }
  0x53   : > { %p433_p11 = por %p432_p6, %p431_p4 }
  0x54   : > { %p429_p1 = pneg %p428_p5 }
  0x56   : > { %p434_p12 = pnand %p433_p11, %p429_p1 }
  0x58   : > { %437 = shalt.err (!%p434_p12)
}
  0x59   : > { %s488_s5 = smov 128   ;;  %s489_s7 = smov 256  }
  0x5a   : > { %s490_s8 = smov 8  }
  0x5b   : > { %316 = dma.vmem_to_hbm [thread:$0]  (%p697_p13), %s631_s25, 256, %s636_s27, %s194_s29, %s488_s5, %s489_s7, %s490_s8  }
  0x5c PF: > { %s221_s28 = sand.u32 1, %s468_s9   ;;  %p698_p7 = scmp.ne.s32.totalorder %s689_s22, 0 }
  0x5d   : > { %p699_p8 = scmp.ge.s32.totalorder %s480_s12, 2  ;;  %s222_s20 = scalar_lea.sflag [#allocation4], %s221_s28 }
  0x5f   : > { %p327_p9 = pnand %p699_p8, %p698_p7 }
  0x61   : > { %p328_p10 = pneg %p327_p9 }
  0x63   : > { %463 = dma.done.wait (%p328_p10), %s222_s20, 256  }
  0x64   : > { %465 = vsyncadd (%p328_p10), %s222_s20, 4294967040  ;;  %p16_p2 = scmp.ge.s32.totalorder %s531_s15, 4   ;;  %s700_s9 = smov %s472_s10 }
  0x65   : > { %s701_s10 = smov %s476_s11  ;;  %s702_s11 = smov %s543_s18 }
  0x66   : > { %s703_s12 = smov %s531_s15  ;;  %18 = sbr.rel (!%p16_p2) target bundleno = 6 (0x6), region = 80 }
  0x6b   :  { %227 = vsyncpa [#allocation3], 1 }
  0x6c   :  { %229 = vsyncpa [#allocation3 + $0x1], 1 }
  0x6d   :  { %230 = vsyncpa [#allocation4], 1 }
  0x6e   :  { %232 = vsyncpa [#allocation4 + $0x1], 1 }
  0x6f   :  { %233 = vsyncpa [#allocation5], 1 }
  0x70   :  { %235 = vsyncpa [#allocation5 + $0x1], 1 }

</bundles_post_ra>
